<compile_context>
chip_gen: v7x
topology: tpu7x:2x2x1
jax: 0.10.0
libtpu: 0.0.40
codegen_flags: <defaults>
</compile_context>

<pallas_src>
import functools
from typing import NamedTuple

import jax
import jax.numpy as jnp
from jax.experimental import pallas as pl
from jax.experimental.pallas import tpu as pltpu

HID1 = 120
HID2 = 84
LANE = 128        # TPU lane width
SUBLANE = 8       # f32 sublane width
ROW_ALIGN = 16    # row alignment that is tile-safe for both f32 (8,128) and bf16 (16,128)


def _round_up(n, m):
    return ((n + m - 1) // m) * m


class QNetMeta(NamedTuple):
    """Static (hashable) shape metadata — kept OUT of the traced pytree."""
    d: int          # real obs_dim
    d_pad: int      # obs_dim rounded up to ROW_ALIGN
    n_actions: int  # real number of actions


def qnetwork_kernel(x_ref, wp_ref, bp_ref, o_ref, *, d_pad, n_actions):
    """Fused 3-layer MLP on one batch tile: (TB, d_pad) -> (TB, n_actions)."""
    cdt = wp_ref.dtype                                   # compute / weight dtype
    x = x_ref[...]                                       # (TB, d_pad)

    # Static, tile-aligned views of the packed weight slab (zero-padded to 128 lanes).
    w1 = wp_ref[0:d_pad, :]                              # (d_pad, 128)
    w2 = wp_ref[d_pad:d_pad + LANE, :]                   # (128, 128)
    w3 = wp_ref[d_pad + LANE:d_pad + 2 * LANE, :]        # (128, 128)
    b1 = bp_ref[0:1, :]                                  # (1, 128) f32
    b2 = bp_ref[1:2, :]
    b3 = bp_ref[2:3, :]

    # Layer 1: Linear + ReLU   (f32 accumulation on the MXU)
    h1 = jnp.dot(x, w1, preferred_element_type=jnp.float32) + b1
    h1 = jnp.maximum(h1, 0.0).astype(cdt)
    # Layer 2: Linear + ReLU
    h2 = jnp.dot(h1, w2, preferred_element_type=jnp.float32) + b2
    h2 = jnp.maximum(h2, 0.0).astype(cdt)
    # Layer 3: Linear (Q-values). Only the real action columns leave VMEM.
    q = jnp.dot(h2, w3, preferred_element_type=jnp.float32) + b3     # (TB, 128) f32
    o_ref[...] = q[:, :n_actions].astype(o_ref.dtype)


def pack_params(params, dtype=jnp.float32):
    """Zero-pad all feature dims (rows to 16, lanes to 128) and pack into one weight
    slab + one bias slab (2 parameter DMAs instead of 6). Biases stay f32; weights
    may be bf16 (f32 accumulation in-kernel) for the v6e/v7x bandwidth win."""
    w1, b1 = params["w1"], params["b1"]
    w2, b2 = params["w2"], params["b2"]
    w3, b3 = params["w3"], params["b3"]
    d = w1.shape[0]
    a = w3.shape[1]
    d_pad = _round_up(d, ROW_ALIGN)

    w1p = jnp.zeros((d_pad, LANE), dtype).at[:d, :HID1].set(w1.astype(dtype))
    w2p = jnp.zeros((LANE, LANE), dtype).at[:HID1, :HID2].set(w2.astype(dtype))
    w3p = jnp.zeros((LANE, LANE), dtype).at[:HID2, :a].set(w3.astype(dtype))
    wp = jnp.concatenate([w1p, w2p, w3p], axis=0)        # (d_pad + 256, 128)

    bp = jnp.zeros((3, LANE), jnp.float32)
    bp = bp.at[0, :HID1].set(b1.reshape(-1).astype(jnp.float32))
    bp = bp.at[1, :HID2].set(b2.reshape(-1).astype(jnp.float32))
    bp = bp.at[2, :a].set(b3.reshape(-1).astype(jnp.float32))

    buffers = {"wp": wp, "bp": bp}                       # traced arrays only
    return buffers, QNetMeta(d=d, d_pad=d_pad, n_actions=a)


def _batch_tile(B, max_tb):
    """Pick the batch tile: big tiles for replay batches (amortize ~0.35us/step),
    >= 2 tiles when B >= 16 so the parallel axis feeds both v7x TensorCores."""
    max_tb = max(ROW_ALIGN, _round_up(max_tb, ROW_ALIGN))
    n_tiles = max(1, -(-B // max_tb))
    if B >= 2 * SUBLANE:
        n_tiles = max(n_tiles, 2)
    tb = _round_up(max(1, -(-B // n_tiles)), ROW_ALIGN)
    return max(ROW_ALIGN, min(tb, max_tb))


@functools.partial(jax.jit, static_argnames=("meta", "max_tb"))
def qnetwork_forward(x, buffers, meta, *, max_tb=2048):
    """x: (B, obs_dim). buffers/meta: from pack_params. Returns (B, n_actions) f32."""
    wp, bp = buffers["wp"], buffers["bp"]
    d, d_pad, a = meta.d, meta.d_pad, meta.n_actions
    B = x.shape[0]

    tb = _batch_tile(B, max_tb)
    b_pad = _round_up(B, tb)

    # bf16 path: cast the streamed input too (halves the x HBM stream); fused under jit.
    if x.dtype != wp.dtype:
        x = x.astype(wp.dtype)
    # Skip the pad entirely when shapes are already aligned; otherwise it fuses under jit.
    if (b_pad, d_pad) != (B, d):
        x = jnp.pad(x, ((0, b_pad - B), (0, d_pad - d)))

    # VMEM budget from the real (lane-padded) block math, with 2x margin.
    itemsize = jnp.dtype(wp.dtype).itemsize
    est = (2 * tb * LANE * itemsize                      # x blocks, double-buffered
           + 2 * tb * LANE * 4                           # out blocks, double-buffered
           + 2 * (d_pad + 2 * LANE + SUBLANE) * LANE * 4  # weight + bias slabs
           + 6 * tb * LANE * 4)                          # h1/h2/q intermediates + slack
    vmem_limit = int(min(48 * 2**20, max(16 * 2**20, 2 * est)))

    kernel = functools.partial(qnetwork_kernel, d_pad=d_pad, n_actions=a)
    out = pl.pallas_call(
        kernel,
        out_shape=jax.ShapeDtypeStruct((b_pad, a), jnp.float32),
        grid=(b_pad // tb,),
        in_specs=[
            pl.BlockSpec((tb, d_pad), lambda i: (i, 0)),                # x tile (streamed)
            pl.BlockSpec((d_pad + 2 * LANE, LANE), lambda i: (0, 0)),   # weights (VMEM-resident)
            pl.BlockSpec((3, LANE), lambda i: (0, 0)),                  # biases  (VMEM-resident)
        ],
        out_specs=pl.BlockSpec((tb, a), lambda i: (i, 0)),
        compiler_params=pltpu.CompilerParams(
            dimension_semantics=("parallel",),           # both TCs on v7x; no-op v5e/v6e
            vmem_limit_bytes=vmem_limit),
    )(x, wp, bp)

    # Batch-row strip fuses with the consumer under jit (no separate HBM copy).
    return out[:B] if b_pad != B else out


def init_params(key, obs_dim, n_actions):
    """Deterministic init mimicking torch.nn.Linear default (uniform +/- 1/sqrt(fan_in))."""
    def linear(k, fan_in, fan_out):
        kw, kb = jax.random.split(k)
        bound = 1.0 / jnp.sqrt(jnp.float32(fan_in))
        w = jax.random.uniform(kw, (fan_in, fan_out), jnp.float32, -bound, bound)
        b = jax.random.uniform(kb, (1, fan_out), jnp.float32, -bound, bound)
        return w, b

    k1, k2, k3 = jax.random.split(key, 3)
    w1, b1 = linear(k1, obs_dim, HID1)
    w2, b2 = linear(k2, HID1, HID2)
    w3, b3 = linear(k3, HID2, n_actions)
    return {"w1": w1, "b1": b1, "w2": w2, "b2": b2, "w3": w3, "b3": b3}


def qnetwork_ref(x, p):
    h1 = jnp.maximum(x @ p["w1"] + p["b1"], 0.0)
    h2 = jnp.maximum(h1 @ p["w2"] + p["b2"], 0.0)
    return h2 @ p["w3"] + p["b3"]


if __name__ == "__main__":
    key = jax.random.PRNGKey(0)
    k_params, k_x, k_x2 = jax.random.split(key, 3)

    batch = 2
    obs_dim = 8       # small Box observation space flattened to 8 features
    n_actions = 4     # small discrete action space

    params = init_params(k_params, obs_dim, n_actions)

    # f32 (reference-exact) path.
    buffers, meta = pack_params(params, dtype=jnp.float32)

    # Small acting-style batch (single tile).
    x = jax.random.normal(k_x, (batch, obs_dim), dtype=jnp.float32)
    out = jax.block_until_ready(qnetwork_forward(x, buffers, meta))
    ref = qnetwork_ref(x, params)
    assert out.shape == (batch, n_actions)
    assert jnp.allclose(out, ref, atol=1e-5, rtol=1e-5), "mismatch vs JAX reference (small batch)"

    # Replay-style batch: >= 2 grid steps (exercises the parallel batch axis / padding).
    x2 = jax.random.normal(k_x2, (600, obs_dim), dtype=jnp.float32)
    out2 = jax.block_until_ready(qnetwork_forward(x2, buffers, meta))
    ref2 = qnetwork_ref(x2, params)
    assert out2.shape == (600, n_actions)
    assert jnp.allclose(out2, ref2, atol=1e-5, rtol=1e-5), "mismatch vs JAX reference (large batch)"

    # bf16 weight/activation path (f32 MXU accumulation) — bandwidth option for v6e/v7x.
    buffers_bf16, meta_bf16 = pack_params(params, dtype=jnp.bfloat16)
    out3 = jax.block_until_ready(qnetwork_forward(x2, buffers_bf16, meta_bf16))
    assert out3.shape == (600, n_actions)
    assert jnp.allclose(out3, ref2, atol=1e-1, rtol=1e-1), "mismatch vs JAX reference (bf16 path)"

    print("KERNEL_OK")
</pallas_src>

<mosaic_0001>
module attributes {stable_mosaic.version = 11 : i64} {
  func.func @qnetwork_kernel(%arg0: i32, %arg1: memref<16x16xf32, #tpu.memory_space<vmem>>, %arg2: memref<272x128xf32, #tpu.memory_space<vmem>>, %arg3: memref<3x128xf32, #tpu.memory_space<vmem>>, %arg4: memref<16x4xf32, #tpu.memory_space<vmem>>) attributes {dimension_semantics = [#tpu.dimension_semantics<parallel>], iteration_bounds = array<i64: 1>, scalar_prefetch = 0 : i64, scratch_operands = 0 : i64, tpu.core_type = #tpu.core_type<tc>, window_params = [{transform_indices = @transform_0, window_bounds = array<i64: 16, 16>}, {pipeline_mode = #tpu.pipeline_mode<synchronous>, transform_indices = @transform_1, window_bounds = array<i64: 272, 128>}, {pipeline_mode = #tpu.pipeline_mode<synchronous>, transform_indices = @transform_2, window_bounds = array<i64: 3, 128>}, {transform_indices = @transform_3, window_bounds = array<i64: 16, 4>}]} {
    %c0 = arith.constant 0 : index
    %c0_0 = arith.constant 0 : index
    %0 = vector.load %arg1[%c0, %c0_0] : memref<16x16xf32, #tpu.memory_space<vmem>>, vector<16x16xf32>
    %c0_1 = arith.constant 0 : index
    %c0_2 = arith.constant 0 : index
    %1 = vector.load %arg2[%c0_1, %c0_2] : memref<272x128xf32, #tpu.memory_space<vmem>>, vector<16x128xf32>
    %c16 = arith.constant 16 : index
    %c0_3 = arith.constant 0 : index
    %2 = vector.load %arg2[%c16, %c0_3] : memref<272x128xf32, #tpu.memory_space<vmem>>, vector<128x128xf32>
    %c144 = arith.constant 144 : index
    %c0_4 = arith.constant 0 : index
    %3 = vector.load %arg2[%c144, %c0_4] : memref<272x128xf32, #tpu.memory_space<vmem>>, vector<128x128xf32>
    %c0_5 = arith.constant 0 : index
    %c0_6 = arith.constant 0 : index
    %4 = vector.load %arg3[%c0_5, %c0_6] : memref<3x128xf32, #tpu.memory_space<vmem>>, vector<1x128xf32>
    %c1 = arith.constant 1 : index
    %c0_7 = arith.constant 0 : index
    %5 = vector.load %arg3[%c1, %c0_7] : memref<3x128xf32, #tpu.memory_space<vmem>>, vector<1x128xf32>
    %c2 = arith.constant 2 : index
    %c0_8 = arith.constant 0 : index
    %6 = vector.load %arg3[%c2, %c0_8] : memref<3x128xf32, #tpu.memory_space<vmem>>, vector<1x128xf32>
    %cst = arith.constant dense<0.000000e+00> : vector<16x128xf32>
    %7 = tpu.matmul %0, %1, %cst {dimension_numbers = #tpu.dot_dimension_numbers<[1], [0], [0], [1], [0, 0, 1, 1], [], []>} : vector<16x16xf32>, vector<16x128xf32>, vector<16x128xf32> -> vector<16x128xf32>
    %8 = vector.broadcast %4 : vector<1x128xf32> to vector<16x128xf32>
    %9 = arith.addf %7, %8 : vector<16x128xf32>
    %cst_9 = arith.constant 0.000000e+00 : f32
    %10 = vector.broadcast %cst_9 : f32 to vector<16x128xf32>
    %11 = arith.maximumf %9, %10 : vector<16x128xf32>
    %cst_10 = arith.constant dense<0.000000e+00> : vector<16x128xf32>
    %12 = tpu.matmul %11, %2, %cst_10 {dimension_numbers = #tpu.dot_dimension_numbers<[1], [0], [0], [1], [0, 0, 1, 1], [], []>} : vector<16x128xf32>, vector<128x128xf32>, vector<16x128xf32> -> vector<16x128xf32>
    %13 = vector.broadcast %5 : vector<1x128xf32> to vector<16x128xf32>
    %14 = arith.addf %12, %13 : vector<16x128xf32>
    %cst_11 = arith.constant 0.000000e+00 : f32
    %15 = vector.broadcast %cst_11 : f32 to vector<16x128xf32>
    %16 = arith.maximumf %14, %15 : vector<16x128xf32>
    %cst_12 = arith.constant dense<0.000000e+00> : vector<16x128xf32>
    %17 = tpu.matmul %16, %3, %cst_12 {dimension_numbers = #tpu.dot_dimension_numbers<[1], [0], [0], [1], [0, 0, 1, 1], [], []>} : vector<16x128xf32>, vector<128x128xf32>, vector<16x128xf32> -> vector<16x128xf32>
    %18 = vector.broadcast %6 : vector<1x128xf32> to vector<16x128xf32>
    %19 = arith.addf %17, %18 : vector<16x128xf32>
    %20 = vector.extract_strided_slice %19 {offsets = [0, 0], sizes = [16, 4], strides = [1, 1]} : vector<16x128xf32> to vector<16x4xf32>
    %c0_13 = arith.constant 0 : index
    %c0_14 = arith.constant 0 : index
    %21 = vector.load %arg4[%c0_13, %c0_14] : memref<16x4xf32, #tpu.memory_space<vmem>>, vector<16x4xf32>
    tpu.vector_store %arg4[%c0_13, %c0_14], %20 {strides = array<i32>} : memref<16x4xf32, #tpu.memory_space<vmem>>, vector<16x4xf32>,
    return
  }
  func.func @transform_0(%arg0: i32) -> (i32, i32) {
    %c0_i32 = arith.constant 0 : i32
    %c0_i32_0 = arith.constant 0 : i32
    return %arg0, %c0_i32 : i32, i32
  }
  func.func @transform_1(%arg0: i32) -> (i32, i32) {
    %c0_i32 = arith.constant 0 : i32
    %c0_i32_0 = arith.constant 0 : i32
    %c0_i32_1 = arith.constant 0 : i32
    return %c0_i32, %c0_i32_0 : i32, i32
  }
  func.func @transform_2(%arg0: i32) -> (i32, i32) {
    %c0_i32 = arith.constant 0 : i32
    %c0_i32_0 = arith.constant 0 : i32
    %c0_i32_1 = arith.constant 0 : i32
    return %c0_i32, %c0_i32_0 : i32, i32
  }
  func.func @transform_3(%arg0: i32) -> (i32, i32) {
    %c0_i32 = arith.constant 0 : i32
    %c0_i32_0 = arith.constant 0 : i32
    return %arg0, %c0_i32 : i32, i32
  }
}

</mosaic_0001>

<bundles_post_ra>
// kernel: qnetwork_forward.1
= control target key start
LH: loop header
LB: loop body
LE: loop exit
PB: predicated region body
PF: predicated region fallthrough
CT: control target
= control target key end

     0   :  { %8 = vsyncpa [#allocation3], 0  ;;  %s540_s12 = smov [#allocation2]   ;;  %s598_s0 = inlined_call_operand.vmem [shape: f32[16,16], index: 0, kind: input, shape index: {}]   ;;  %s599_s1 = inlined_call_operand.hbm [shape: f32[272,128], index: 1, kind: input, shape index: {}]   ;;  %s600_s2 = inlined_call_operand.vmem [shape: f32[3,128], index: 2, kind: input, shape index: {}]   ;;  %s601_s3 = inlined_call_operand.vmem [shape: f32[16,4], index: 3, kind: output, shape index: {}]  }
   0x1   :  { %s16_s13 = sshll.u32 %s540_s12, 4  ;;  %s516_s16 = scalar_lea.hbm %s599_s1, 4352  ;;  %s17_s13 = int_to_ptr.vmem [resolvable:$true] %s16_s13 }
   0x2   :  { %p517_p0 = scmp.ne.s32.totalorder %s599_s1, %s516_s16  ;;  %p520_p1 = scmp.lt.u32.totalorder %s516_s16, %s599_s1 }
   0x4   :  { %p522_p2 = pnand %p520_p1, %p517_p0 }
   0x6   :  { %525 = shalt.err (!%p522_p2)
}
   0x7   :  { %s526_s21 = scalar_lea.vmem %s17_s13, 4352  ;;  %p531_p4 = scmp.lt.s32.totalorder %s17_s13, %s17_s13 }
   0x8   :  { %p527_p3 = scmp.ne.s32.totalorder %s17_s13, %s526_s21  ;;  %p532_p5 = scmp.lt.s32.totalorder %s526_s21, %s526_s21 }
   0xa   :  { %p533_p6 = por %p532_p5, %p531_p4 }
   0xc   :  { %p534_p7 = pnand %p533_p6, %p527_p3 }
   0xe   :  { %537 = shalt.err (!%p534_p7)
}
   0xf   :  { %s541_s22 = smov 128   ;;  %s542_s23 = smov 8  }
  0x10   :  { %22 = dma.hbm_to_vmem [thread:$0]  %s599_s1, 4352, %s17_s13, [#allocation3], %s541_s22, %s541_s22, %s542_s23  }
  0x11   :  { %538 = dma.done.wait [#allocation3], 4352  }
  0x12   :  { %539 = vsyncadd [#allocation3], 4294962944  ;;  %vm71_vm0 = vcmask 130048   ;;  %v30_v0 = vld [vmem:[#allocation2] sm:$0xff]  ;;  %v31_v1 = vld [vmem:[#allocation2 + $0x8] sm:$0xff]  ;;  %vm315_vm1 = vcmask 31744  }
  0x13   :  { %v28_v2 = vld [vmem:[%s598_s0] sm:$0xff]  ;;  %v445_v3 = vpack.c.bf16 %v31_v1, %v30_v0  ;;  %v32_v4 = vld [vmem:[#allocation2 + $0x10] sm:$0xff]  ;;  %v33_v5 = vld [vmem:[#allocation2 + $0x18] sm:$0xff] }
  0x14   :  { %372 = vmatprep.mubr.msk.f32.mxu0 %vm71_vm0, %v28_v2  ;;  %v449_v6 = vpack.c.bf16 %v33_v5, %v32_v4  ;;  %v34_v7 = vld [vmem:[#allocation2 + $0x20] sm:$0xff]  ;;  %v35_v8 = vld [vmem:[#allocation2 + $0x28] sm:$0xff]  ;;  %v36_v10 = vld [vmem:[#allocation2 + $0x30] sm:$0xff] }
  0x15   :  { %446 = vmatprep.subr.bf16.mxu0 %v445_v3  ;;  %v453_v9 = vpack.c.bf16 %v35_v8, %v34_v7  ;;  %v37_v11 = vld [vmem:[#allocation2 + $0x38] sm:$0xff]  ;;  %v29_v12 = vld [vmem:[%s598_s0 + $0x8] sm:$0xff]  ;;  %v38_v14 = vld [vmem:[#allocation2 + $0x40] sm:$0xff] }
  0x16   :  { %448 = vmatpush3.bf16.msra.mxu0 %v445_v3  ;;  %450 = vmatprep.subr.bf16.mxu1 %v449_v6  ;;  %v457_v13 = vpack.c.bf16 %v37_v11, %v36_v10  ;;  %v39_v15 = vld [vmem:[#allocation2 + $0x48] sm:$0xff]  ;;  %v40_v17 = vld [vmem:[#allocation2 + $0x50] sm:$0xff]  ;;  %v41_v18 = vld [vmem:[#allocation2 + $0x58] sm:$0xff] }
  0x17   :  { %452 = vmatpush3.bf16.msra.mxu1 %v449_v6  ;;  %v461_v16 = vpack.c.bf16 %v39_v15, %v38_v14  ;;  %v465_v19 = vpack.c.bf16 %v41_v18, %v40_v17  ;;  %v42_v20 = vld [vmem:[#allocation2 + $0x60] sm:$0xff]  ;;  %v43_v21 = vld [vmem:[#allocation2 + $0x68] sm:$0xff]  ;;  %v44_v23 = vld [vmem:[#allocation2 + $0x70] sm:$0xff] }
  0x18   :  { %454 = vmatprep.subr.bf16.mxu1 %v453_v9  ;;  %v469_v22 = vpack.c.bf16 %v43_v21, %v42_v20  ;;  %v45_v24 = vld [vmem:[#allocation2 + $0x78] sm:$0xff]  ;;  %v46_v26 = vld [vmem:[#allocation2 + $0x80] sm:$0xff]  ;;  %v47_v27 = vld [vmem:[#allocation2 + $0x88] sm:$0xff] }
  0x19   :  { %373 = vmatmul.mubr.msk.f32.vlgmr.msra.gmra.mrb[0].mxu0 %vm71_vm0, %v29_v12  ;;  %v473_v25 = vpack.c.bf16 %v45_v24, %v44_v23  ;;  %v477_v28 = vpack.c.bf16 %v47_v27, %v46_v26  ;;  %v48_v29 = vld [vmem:[#allocation2 + $0x90] sm:$0xff]  ;;  %v49_v30 = vld [vmem:[#allocation2 + $0x98] sm:$0xff]  ;;  %v50_v31 = vld [vmem:[#allocation2 + $0xa0] sm:$0xff] }
  0x1a   :  { %v481_v32 = vpack.c.bf16 %v49_v30, %v48_v29  ;;  %v51_v33 = vld [vmem:[#allocation2 + $0xa8] sm:$0xff]  ;;  %v52_v35 = vld [vmem:[#allocation2 + $0xb0] sm:$0xff]  ;;  %v53_v36 = vld [vmem:[#allocation2 + $0xb8] sm:$0xff] }
  0x1b   :  { %456 = vmatpush3.bf16.msra.mxu1 %v453_v9  ;;  %v485_v34 = vpack.c.bf16 %v51_v33, %v50_v31  ;;  %v489_v37 = vpack.c.bf16 %v53_v36, %v52_v35  ;;  %v54_v38 = vld [vmem:[#allocation2 + $0xc0] sm:$0xff]  ;;  %v55_v39 = vld [vmem:[#allocation2 + $0xc8] sm:$0xff]  ;;  %v56_v41 = vld [vmem:[#allocation2 + $0xd0] sm:$0xff] }
  0x1c   :  { %458 = vmatprep.subr.bf16.mxu1 %v457_v13  ;;  %482 = vmatprep.subr.bf16.mxu0 %v481_v32  ;;  %v493_v40 = vpack.c.bf16 %v55_v39, %v54_v38  ;;  %v57_v42 = vld [vmem:[#allocation2 + $0xd8] sm:$0xff]  ;;  %v58_v44 = vld [vmem:[#allocation2 + $0xe0] sm:$0xff]  ;;  %v59_v45 = vld [vmem:[#allocation2 + $0xe8] sm:$0xff] }
  0x1d   :  { %484 = vmatpush3.bf16.msra.mxu0 %v481_v32  ;;  %v497_v43 = vpack.c.bf16 %v57_v42, %v56_v41  ;;  %v501_v46 = vpack.c.bf16 %v59_v45, %v58_v44  ;;  %v60_v47 = vld [vmem:[#allocation2 + $0xf0] sm:$0xff]  ;;  %v61_v48 = vld [vmem:[#allocation2 + $0xf8] sm:$0xff]  ;;  %v323_v50 = vld [vmem:[%s600_s2] ss:$0 sm:$0xff] }
  0x1e   :  { %486 = vmatprep.subr.bf16.mxu0 %v485_v34  ;;  %v505_v49 = vpack.c.bf16 %v61_v48, %v60_v47  ;;  %v62_v57 = vld [vmem:[#allocation2 + $0x100] sm:$0xff]  ;;  %v63_v58 = vld [vmem:[#allocation2 + $0x108] sm:$0xff] }
  0x1f   :  { %460 = vmatpush3.bf16.msra.mxu1 %v457_v13  ;;  %v509_v59 = vpack.c.bf16 %v63_v58, %v62_v57  ;;  %v326_v60 = vld [vmem:[%s600_s2 + $0x1] ss:$0 sm:$0xff]  ;;  %v327_v3 = vld [vmem:[%s600_s2 + $0x2] ss:$0 sm:$0xff] }
  0x20   :  { %462 = vmatprep.subr.bf16.mxu1 %v461_v16 }
  0x21   :  { %488 = vmatpush3.bf16.msra.mxu0 %v485_v34 }
  0x22   :  { %490 = vmatprep.subr.bf16.mxu0 %v489_v37 }
  0x23   :  { %464 = vmatpush3.bf16.msra.mxu1 %v461_v16 }
  0x24   :  { %466 = vmatprep.subr.bf16.mxu1 %v465_v19 }
  0x25   :  { %492 = vmatpush3.bf16.msra.mxu0 %v489_v37 }
  0x26   :  { %494 = vmatprep.subr.bf16.mxu0 %v493_v40 }
  0x27   :  { %468 = vmatpush3.bf16.msra.mxu1 %v465_v19 }
  0x28   :  { %470 = vmatprep.subr.bf16.mxu1 %v469_v22 }
  0x29   :  { %496 = vmatpush3.bf16.msra.mxu0 %v493_v40 }
  0x2a   :  { %498 = vmatprep.subr.bf16.mxu0 %v497_v43 }
  0x2b   :  { %472 = vmatpush3.bf16.msra.mxu1 %v469_v22 }
  0x2c   :  { %474 = vmatprep.subr.bf16.mxu1 %v473_v25 }
  0x2d   :  { %500 = vmatpush3.bf16.msra.mxu0 %v497_v43 }
  0x2e   :  { %502 = vmatprep.subr.bf16.mxu0 %v501_v46 }
  0x2f   :  { %476 = vmatpush3.bf16.msra.mxu1 %v473_v25 }
  0x30   :  { %478 = vmatprep.subr.bf16.mxu1 %v477_v28 }
  0x31   :  { %504 = vmatpush3.bf16.msra.mxu0 %v501_v46 }
  0x32   :  { %506 = vmatprep.subr.bf16.mxu0 %v505_v49 }
  0x33   :  { %480 = vmatpush3.bf16.msra.mxu1 %v477_v28 }
  0x35   :  { %508 = vmatpush3.bf16.msra.mxu0 %v505_v49 }
  0x36   :  { %510 = vmatprep.subr.bf16.mxu0 %v509_v59 }
  0x39   :  { %512 = vmatpush3.bf16.msra.mxu0 %v509_v59 }
  0xec   :  { %v374_v51 = vpop.f32.mrb[0].mxu0 }
  0xed   :  { %v150_v52 = vadd.f32 %v374_v51, %v323_v50  ;;  %v144_v53 = vpop.f32.mrb[1].mxu0 }
  0xee   :  { %v145_v54 = vadd.f32 %v323_v50, %v144_v53 }
  0xef   :  { %v154_v56 = vmax.f32 %v150_v52, 0.0 }
  0xf0   :  { %v153_v55 = vmax.f32 %v145_v54, 0.0 }
  0xf2   :  { %407 = vmatprep.mubr.f32.mxu1 %v153_v55 }
  0xf3   :  { %408 = vmatmul.mubr.f32.vlgmr.msra.gmra.mrb[0].mxu1 %v154_v56 }
 0x1c6   :  { %v409_v61 = vpop.f32.mrb[0].mxu1 }
 0x1c7   :  { %v231_v62 = vadd.f32 %v409_v61, %v326_v60  ;;  %v225_v63 = vpop.f32.mrb[1].mxu1 }
 0x1c8   :  { %v226_v0 = vadd.f32 %v326_v60, %v225_v63 }
 0x1c9   :  { %v235_v2 = vmax.f32 %v231_v62, 0.0 }
 0x1ca   :  { %v234_v1 = vmax.f32 %v226_v0, 0.0 }
 0x1cc   :  { %442 = vmatprep.mubr.f32.mxu0 %v234_v1 }
 0x1cd   :  { %443 = vmatmul.mubr.f32.vlgmr.msra.gmra.mrb[2].mxu0 %v235_v2 }
 0x2a0   :  { %v444_v4 = vpop.f32.mrb[2].mxu0 }
 0x2a1   :  { %v312_v5 = vadd.f32 %v444_v4, %v327_v3  ;;  %v306_v6 = vpop.f32.mrb[3].mxu0 }
 0x2a2   :  { %v307_v7 = vadd.f32 %v327_v3, %v306_v6 }
 0x2a3   :  { %317 = vst.msk [vmem:[%s601_s3 + $0x8] sm:$0xff] %vm315_vm1, %v312_v5 }
 0x2a4   :  { %316 = vst.msk [vmem:[%s601_s3] sm:$0xff] %vm315_vm1, %v307_v7 }
 0x2a5   :  { %322 = vsyncpa [#allocation3], 1 }

</bundles_post_ra>
